<compile_context>
chip_gen: v7x
topology: tpu7x:2x2x1
jax: 0.10.0
libtpu: 0.0.40
codegen_flags: <defaults>
</compile_context>

<pallas_src>
import functools

import jax
import jax.numpy as jnp
from jax.experimental import pallas as pl
from jax.experimental.pallas import tpu as pltpu


def _cdiv(a, b):
    return (a + b - 1) // b


def _choose_block_rows(B, C, itemsize):
    """Pick a batch-tile height from a conservative VMEM budget."""
    budget = 10 * 1024 * 1024                      # pipelined input buffers
    per_row = 2 * C * itemsize + 2 * 128 * 4       # 2x logits + 2x lane-padded tgt
    bt = budget // per_row
    bt = max(8, min(int(bt), 16384))
    if bt >= B:
        return B                                   # one full block, no masking
    return max(8, (bt // 8) * 8)                   # sublane-aligned


def _bsl_kernel(logits_ref, tgt_ref, counts_ref, nll_ref, *, true_b, steps):
    p = pl.program_id(0)      # parallel batch split (megacore on v7x)
    s = pl.program_id(1)      # batch-reduction step within the split

    @pl.when(s == 0)
    def _init():
        counts_ref[...] = jnp.zeros_like(counts_ref)
        nll_ref[...] = jnp.zeros_like(nll_ref)

    bt, C = logits_ref.shape
    x = logits_ref[...].astype(jnp.float32)        # per-tile in-vreg upcast
    tgt = tgt_ref[...]                             # (bt, 1) int32

    # Row-validity mask for the (possibly) partial / overshoot tile.
    row0 = (p * steps + s) * bt
    row_ids = jax.lax.broadcasted_iota(jnp.int32, (bt, 1), 0)
    valid = (row0 + row_ids) < true_b              # (bt, 1) bool

    class_ids = jax.lax.broadcasted_iota(jnp.int32, (bt, C), 1)
    match = jnp.logical_and(tgt == class_ids, valid)      # (bt, C) bool
    one_hot = match.astype(jnp.float32)

    # bincount partial: offload the sublane reduction to the (idle) MXU.
    counts_ref[...] += jnp.dot(
        jnp.ones((1, bt), jnp.float32), one_hot,
        preferred_element_type=jnp.float32)[None]          # (1, 1, C)

    # Numerically stable NLL: (max + log-sum-exp) - target_logit, no full logp.
    m = jnp.max(x, axis=1, keepdims=True)                  # (bt, 1)
    lse = jnp.log(jnp.sum(jnp.exp(x - m), axis=1, keepdims=True))
    tgt_logit = jnp.sum(jnp.where(match, x, 0.0), axis=1, keepdims=True)
    nll_rows = jnp.where(valid, (m + lse) - tgt_logit, 0.0)  # mask garbage rows
    nll_ref[...] += jnp.sum(nll_rows, axis=0, keepdims=True)[None]   # (1, 1, 1)


def balanced_softmax_loss(logits, targets, *, beta=0.8, block_rows=None):
    """logits: (B, C) float (any float dtype), targets: (B,) int -> scalar f32."""
    B, C = logits.shape
    assert targets.shape[0] == B
    tgt2d = targets.astype(jnp.int32).reshape(B, 1)

    itemsize = jnp.dtype(logits.dtype).itemsize
    if block_rows is None:
        bt = _choose_block_rows(B, C, itemsize)
    else:
        bt = min(int(block_rows), B)
        if bt < B:
            bt = max(8, (bt // 8) * 8)

    nb = _cdiv(B, bt)                 # number of batch blocks
    num_splits = 2 if nb >= 2 else 1  # leading parallel axis (v7x megacore)
    steps = _cdiv(nb, num_splits)

    # VMEM: double-buffered logits + lane-padded targets tiles + tiny outputs.
    vmem_needed = (2 * bt * C * itemsize
                   + 2 * bt * 128 * 4
                   + 2 * (max(C, 128) * 4 + 128 * 4))
    vmem_limit = int(min(max(vmem_needed + (8 << 20), 16 << 20), 48 << 20))

    def _blk(p, s):
        # Clamp so an overshoot step never issues a fully out-of-bounds DMA;
        # the in-kernel row mask zeroes its contribution regardless.
        return jnp.minimum(p * steps + s, nb - 1)

    kernel = functools.partial(_bsl_kernel, true_b=B, steps=steps)

    counts_part, nll_part = pl.pallas_call(
        kernel,
        out_shape=(jax.ShapeDtypeStruct((num_splits, 1, C), jnp.float32),
                   jax.ShapeDtypeStruct((num_splits, 1, 1), jnp.float32)),
        grid=(num_splits, steps),
        in_specs=[
            pl.BlockSpec((bt, C), lambda p, s: (_blk(p, s), 0)),
            pl.BlockSpec((bt, 1), lambda p, s: (_blk(p, s), 0)),
        ],
        out_specs=[
            pl.BlockSpec((1, 1, C), lambda p, s: (p, 0, 0)),
            pl.BlockSpec((1, 1, 1), lambda p, s: (p, 0, 0)),
        ],
        compiler_params=pltpu.CompilerParams(
            dimension_semantics=("parallel", "arbitrary"),
            vmem_limit_bytes=vmem_limit,
        ),
    )(logits, tgt2d)

    # Tiny O(C) epilogue in plain JAX (combines the per-core partials).
    counts = jnp.sum(counts_part.reshape(num_splits, C), axis=0)     # (C,)
    nll_sum = jnp.sum(nll_part)                                      # scalar
    freq = counts / jnp.sum(counts)
    weights = 1.0 - beta ** freq
    ce = nll_sum / B
    return ce * jnp.mean(weights)


# Pure-JAX reference (matches the PyTorch module) for verification.
def _reference(logits, targets, beta):
    C = logits.shape[1]
    counts = jnp.zeros((C,), jnp.float32).at[targets].add(1.0)
    freq = counts / jnp.sum(counts)
    weights = 1.0 - beta ** freq
    logp = jax.nn.log_softmax(logits.astype(jnp.float32), axis=1)
    ce = -jnp.mean(jnp.take_along_axis(logp, targets[:, None], axis=1))
    return jnp.mean(ce * weights)


if __name__ == "__main__":
    key = jax.random.PRNGKey(0)
    k1, k2, k3, k4 = jax.random.split(key, 4)

    # Case 1: small demo shapes consistent with the module (B=128, C=4).
    B, C = 128, 4
    logits = jax.random.normal(k1, (B, C), dtype=jnp.float32)
    targets = jax.random.randint(k2, (B,), 0, C, dtype=jnp.int32)
    loss = jax.jit(functools.partial(balanced_softmax_loss, beta=0.8))(logits, targets)
    loss = jax.block_until_ready(loss)
    ref = _reference(logits, targets, 0.8)
    assert loss.shape == (), loss.shape
    assert bool(jnp.isfinite(loss)), loss
    assert jnp.allclose(loss, ref, rtol=2e-4, atol=1e-5), (loss, ref)

    # Case 2: exercises multi-tile streaming, the parallel split, block-index
    # clamping and the in-kernel partial-tile mask (B not a multiple of bt).
    B2, C2 = 300, 8
    logits2 = jax.random.normal(k3, (B2, C2), dtype=jnp.float32)
    targets2 = jax.random.randint(k4, (B2,), 0, C2, dtype=jnp.int32)
    loss2 = jax.jit(
        functools.partial(balanced_softmax_loss, beta=0.8, block_rows=64)
    )(logits2, targets2)
    loss2 = jax.block_until_ready(loss2)
    ref2 = _reference(logits2, targets2, 0.8)
    assert bool(jnp.isfinite(loss2)), loss2
    assert jnp.allclose(loss2, ref2, rtol=2e-4, atol=1e-5), (loss2, ref2)

    print("KERNEL_OK")
</pallas_src>

<mosaic_0001>
module attributes {stable_mosaic.version = 11 : i64} {
  func.func @_bsl_kernel(%arg0: i32, %arg1: i32, %arg2: memref<128x4xf32, #tpu.memory_space<vmem>>, %arg3: memref<128x1xi32, #tpu.memory_space<vmem>>, %arg4: memref<1x1x4xf32, #tpu.memory_space<vmem>>, %arg5: memref<1x1x1xf32, #tpu.memory_space<vmem>>) attributes {dimension_semantics = [#tpu.dimension_semantics<parallel>, #tpu.dimension_semantics<arbitrary>], iteration_bounds = array<i64: 1, 1>, scalar_prefetch = 0 : i64, scratch_operands = 0 : i64, tpu.core_type = #tpu.core_type<tc>, window_params = [{transform_indices = @transform_0, window_bounds = array<i64: 128, 4>}, {transform_indices = @transform_1, window_bounds = array<i64: 128, 1>}, {transform_indices = @transform_2, window_bounds = array<i64: 1, 1, 4>}, {transform_indices = @transform_3, window_bounds = array<i64: 1, 1, 1>}]} {
    %c0_i32 = arith.constant 0 : i32
    %0 = arith.cmpi eq, %arg1, %c0_i32 : i32
    %1 = arith.extui %0 : i1 to i32
    %c0_i32_0 = arith.constant 0 : i32
    %2 = arith.cmpi ne, %1, %c0_i32_0 : i32
    scf.if %2 {
      %cst_24 = arith.constant 0.000000e+00 : f32
      %48 = vector.broadcast %cst_24 : f32 to vector<1x1x4xf32>
      %c0_25 = arith.constant 0 : index
      %c0_26 = arith.constant 0 : index
      %c0_27 = arith.constant 0 : index
      %49 = vector.load %arg4[%c0_25, %c0_26, %c0_27] : memref<1x1x4xf32, #tpu.memory_space<vmem>>, vector<1x1x4xf32>
      tpu.vector_store %arg4[%c0_25, %c0_26, %c0_27], %48 {strides = array<i32>} : memref<1x1x4xf32, #tpu.memory_space<vmem>>, vector<1x1x4xf32>,
      %cst_28 = arith.constant 0.000000e+00 : f32
      %50 = vector.broadcast %cst_28 : f32 to vector<1x1x1xf32>
      %c0_29 = arith.constant 0 : index
      %c0_30 = arith.constant 0 : index
      %c0_31 = arith.constant 0 : index
      %51 = vector.load %arg5[%c0_29, %c0_30, %c0_31] : memref<1x1x1xf32, #tpu.memory_space<vmem>>, vector<1x1x1xf32>
      tpu.vector_store %arg5[%c0_29, %c0_30, %c0_31], %50 {strides = array<i32>} : memref<1x1x1xf32, #tpu.memory_space<vmem>>, vector<1x1x1xf32>,
    } else {
    }
    %c0 = arith.constant 0 : index
    %c0_1 = arith.constant 0 : index
    %3 = vector.load %arg2[%c0, %c0_1] : memref<128x4xf32, #tpu.memory_space<vmem>>, vector<128x4xf32>
    %c0_2 = arith.constant 0 : index
    %c0_3 = arith.constant 0 : index
    %4 = vector.load %arg3[%c0_2, %c0_3] : memref<128x1xi32, #tpu.memory_space<vmem>>, vector<128x1xi32>
    %c1_i32 = arith.constant 1 : i32
    %5 = arith.muli %arg0, %c1_i32 : i32
    %6 = arith.addi %5, %arg1 : i32
    %c128_i32 = arith.constant 128 : i32
    %7 = arith.muli %6, %c128_i32 : i32
    %8 = tpu.iota {dimensions = array<i32: 0>} : vector<128x1xi32>
    %9 = vector.broadcast %7 : i32 to vector<128x1xi32>
    %10 = arith.addi %9, %8 : vector<128x1xi32>
    %c128_i32_4 = arith.constant 128 : i32
    %11 = vector.broadcast %c128_i32_4 : i32 to vector<128x1xi32>
    %12 = arith.cmpi slt, %10, %11 : vector<128x1xi32>
    %13 = tpu.iota {dimensions = array<i32: 1>} : vector<128x4xi32>
    %14 = vector.broadcast %4 : vector<128x1xi32> to vector<128x4xi32>
    %15 = arith.cmpi eq, %14, %13 : vector<128x4xi32>
    %16 = vector.broadcast %12 : vector<128x1xi1> to vector<128x4xi1>
    %17 = arith.andi %15, %16 : vector<128x4xi1>
    %18 = arith.extui %17 : vector<128x4xi1> to vector<128x4xi32>
    %19 = arith.sitofp %18 : vector<128x4xi32> to vector<128x4xf32>
    %c0_5 = arith.constant 0 : index
    %c0_6 = arith.constant 0 : index
    %c0_7 = arith.constant 0 : index
    %20 = vector.load %arg4[%c0_5, %c0_6, %c0_7] : memref<1x1x4xf32, #tpu.memory_space<vmem>>, vector<1x1x4xf32>
    %cst = arith.constant 1.000000e+00 : f32
    %21 = vector.broadcast %cst : f32 to vector<1x128xf32>
    %cst_8 = arith.constant dense<0.000000e+00> : vector<1x4xf32>
    %22 = tpu.matmul %21, %19, %cst_8 {dimension_numbers = #tpu.dot_dimension_numbers<[1], [0], [0], [1], [0, 0, 1, 1], [], []>} : vector<1x128xf32>, vector<128x4xf32>, vector<1x4xf32> -> vector<1x4xf32>
    %23 = vector.shape_cast %22 : vector<1x4xf32> to vector<1x1x4xf32>
    %24 = arith.addf %20, %23 : vector<1x1x4xf32>
    %c0_9 = arith.constant 0 : index
    %c0_10 = arith.constant 0 : index
    %c0_11 = arith.constant 0 : index
    %25 = vector.load %arg4[%c0_9, %c0_10, %c0_11] : memref<1x1x4xf32, #tpu.memory_space<vmem>>, vector<1x1x4xf32>
    tpu.vector_store %arg4[%c0_9, %c0_10, %c0_11], %24 {strides = array<i32>} : memref<1x1x4xf32, #tpu.memory_space<vmem>>, vector<1x1x4xf32>,
    %cst_12 = arith.constant dense<0xFF800000> : vector<128xf32>
    %26 = vector.multi_reduction <maximumf>, %3, %cst_12 [1] : vector<128x4xf32> to vector<128xf32>
    %27 = vector.shape_cast %26 : vector<128xf32> to vector<128x1xf32>
    %28 = vector.broadcast %27 : vector<128x1xf32> to vector<128x4xf32>
    %29 = arith.subf %3, %28 : vector<128x4xf32>
    %30 = math.exp %29 : vector<128x4xf32>
    %cst_13 = arith.constant dense<0.000000e+00> : vector<128xf32>
    %31 = vector.multi_reduction <add>, %30, %cst_13 [1] : vector<128x4xf32> to vector<128xf32>
    %32 = vector.shape_cast %31 : vector<128xf32> to vector<128x1xf32>
    %33 = math.log %32 : vector<128x1xf32>
    %cst_14 = arith.constant 0.000000e+00 : f32
    %34 = vector.broadcast %cst_14 : f32 to vector<128x4xf32>
    %35 = arith.select %17, %3, %34 : vector<128x4xi1>, vector<128x4xf32>
    %cst_15 = arith.constant dense<0.000000e+00> : vector<128xf32>
    %36 = vector.multi_reduction <add>, %35, %cst_15 [1] : vector<128x4xf32> to vector<128xf32>
    %37 = vector.shape_cast %36 : vector<128xf32> to vector<128x1xf32>
    %38 = arith.addf %27, %33 : vector<128x1xf32>
    %39 = arith.subf %38, %37 : vector<128x1xf32>
    %cst_16 = arith.constant 0.000000e+00 : f32
    %40 = vector.broadcast %cst_16 : f32 to vector<128x1xf32>
    %41 = arith.select %12, %39, %40 : vector<128x1xi1>, vector<128x1xf32>
    %c0_17 = arith.constant 0 : index
    %c0_18 = arith.constant 0 : index
    %c0_19 = arith.constant 0 : index
    %42 = vector.load %arg5[%c0_17, %c0_18, %c0_19] : memref<1x1x1xf32, #tpu.memory_space<vmem>>, vector<1x1x1xf32>
    %cst_20 = arith.constant dense<0.000000e+00> : vector<1xf32>
    %43 = vector.multi_reduction <add>, %41, %cst_20 [0] : vector<128x1xf32> to vector<1xf32>
    %44 = vector.shape_cast %43 : vector<1xf32> to vector<1x1xf32>
    %45 = vector.shape_cast %44 : vector<1x1xf32> to vector<1x1x1xf32>
    %46 = arith.addf %42, %45 : vector<1x1x1xf32>
    %c0_21 = arith.constant 0 : index
    %c0_22 = arith.constant 0 : index
    %c0_23 = arith.constant 0 : index
    %47 = vector.load %arg5[%c0_21, %c0_22, %c0_23] : memref<1x1x1xf32, #tpu.memory_space<vmem>>, vector<1x1x1xf32>
    tpu.vector_store %arg5[%c0_21, %c0_22, %c0_23], %46 {strides = array<i32>} : memref<1x1x1xf32, #tpu.memory_space<vmem>>, vector<1x1x1xf32>,
    return
  }
  func.func @transform_0(%arg0: i32, %arg1: i32) -> (i32, i32) {
    %c1_i32 = arith.constant 1 : i32
    %0 = arith.muli %arg0, %c1_i32 : i32
    %1 = arith.addi %0, %arg1 : i32
    %c0_i32 = arith.constant 0 : i32
    %2 = arith.minsi %1, %c0_i32 : i32
    %c0_i32_0 = arith.constant 0 : i32
    %c0_i32_1 = arith.constant 0 : i32
    return %2, %c0_i32_0 : i32, i32
  }
  func.func @transform_1(%arg0: i32, %arg1: i32) -> (i32, i32) {
    %c1_i32 = arith.constant 1 : i32
    %0 = arith.muli %arg0, %c1_i32 : i32
    %1 = arith.addi %0, %arg1 : i32
    %c0_i32 = arith.constant 0 : i32
    %2 = arith.minsi %1, %c0_i32 : i32
    %c0_i32_0 = arith.constant 0 : i32
    %c0_i32_1 = arith.constant 0 : i32
    return %2, %c0_i32_0 : i32, i32
  }
  func.func @transform_2(%arg0: i32, %arg1: i32) -> (i32, i32, i32) {
    %c0_i32 = arith.constant 0 : i32
    %c0_i32_0 = arith.constant 0 : i32
    %c0_i32_1 = arith.constant 0 : i32
    return %arg0, %c0_i32, %c0_i32_0 : i32, i32, i32
  }
  func.func @transform_3(%arg0: i32, %arg1: i32) -> (i32, i32, i32) {
    %c0_i32 = arith.constant 0 : i32
    %c0_i32_0 = arith.constant 0 : i32
    %c0_i32_1 = arith.constant 0 : i32
    return %arg0, %c0_i32, %c0_i32_0 : i32, i32, i32
  }
}

</mosaic_0001>

<bundles_post_ra>
// kernel: balanced_softmax_loss.1
= control target key start
LH: loop header
LB: loop body
LE: loop exit
PB: predicated region body
PF: predicated region fallthrough
CT: control target
= control target key end

     0   :  { %v939_v2 = vmov 0   ;;  %v940_v9 = vmov 0.0|0.0   ;;  %s1411_s0 = inlined_call_operand.vmem [shape: f32[128,4], index: 0, kind: input, shape index: {}]   ;;  %s1412_s1 = inlined_call_operand.vmem [shape: s32[128,1], index: 1, kind: input, shape index: {}]   ;;  %s1413_s2 = inlined_call_operand.vmem [shape: f32[1,1,4], index: 2, kind: output, shape index: {0}]   ;;  %s1414_s3 = inlined_call_operand.hbm [shape: f32[1,1,1], index: 3, kind: output, shape index: {1}]  }
   0x1   :  { %v104_v0 = vld [vmem:[%s1412_s1 + $0x10] sm:$0xff]  ;;  %v102_v1 = vld [vmem:[%s1412_s1] sm:$0xff]  ;;  %850 = vset.pattern.permute.xlu1 %v939_v2  ;;  %849 = vset.pattern.permute.xlu0 %v939_v2  ;;  %v105_v3 = vld [vmem:[%s1412_s1 + $0x18] sm:$0xff] }
   0x2   :  { %179 = vperm.xlu1 %850, %v104_v0   ;;  %173 = vperm.xlu0 %849, %v102_v1   ;;  %v103_v4 = vld [vmem:[%s1412_s1 + $0x8] sm:$0xff]  ;;  %v106_v6 = vld [vmem:[%s1412_s1 + $0x20] sm:$0xff]  ;;  %v109_v7 = vld [vmem:[%s1412_s1 + $0x38] sm:$0xff] }
   0x3   :  { %v107_v5 = vld [vmem:[%s1412_s1 + $0x28] sm:$0xff]  ;;  %v108_v8 = vld [vmem:[%s1412_s1 + $0x30] sm:$0xff]  ;;  %818 = vmatprep.subr.bf16.mxu0 %v940_v9 }
   0x6   :  { %182 = vperm.xlu1 %850, %v105_v3   ;;  %176 = vperm.xlu0 %849, %v103_v4  }
   0xa   :  { %188 = vperm.xlu1 %850, %v107_v5   ;;  %185 = vperm.xlu0 %849, %v106_v6  }
   0xb   :  { %9 = vsyncpa [#allocation3], 0  ;;  %v111_v10 = vld [vmem:[%s1412_s1 + $0x48] sm:$0xff]  ;;  %v110_v11 = vld [vmem:[%s1412_s1 + $0x40] sm:$0xff]  ;;  %vm390_vm0 = vcmask 31744   ;;  %vm941_vm1 = vmmov 0   ;;  %v170_v51 = vlaneseq }
   0xc   :  { %v113_v12 = vld [vmem:[%s1412_s1 + $0x58] sm:$0xff]  ;;  %v112_v13 = vld [vmem:[%s1412_s1 + $0x50] sm:$0xff]  ;;  %v115_v14 = vld [vmem:[%s1412_s1 + $0x68] sm:$0xff]  ;;  %v942_v50 = vmov 0.0   ;;  %vm82_vm2 = vcmask 24576   ;;  %vm84_vm3 = vcmask 0  }
   0xd   :  { %v114_v15 = vld [vmem:[%s1412_s1 + $0x60] sm:$0xff]  ;;  %v117_v16 = vld [vmem:[%s1412_s1 + $0x78] sm:$0xff]  ;;  %v116_v17 = vld [vmem:[%s1412_s1 + $0x70] sm:$0xff]  ;;  %815 = vmatprep.mubr.msk.f32.mxu0 %vm941_vm1, %v942_v50  ;;  %83 = vst.msk [vmem:[%s1413_s2] sm:$0x1] %vm82_vm2, %v942_v50  ;;  %v1132_v52 = vand.u32 127, %v170_v51 }
   0xe   :  { %194 = vperm.xlu1 %850, %v109_v7   ;;  %191 = vperm.xlu0 %849, %v108_v8   ;;  %v1018_v18 = vld [vmem:[%s1411_s0] sm:$0xff]  ;;  %v1025_v20 = vld [vmem:[%s1411_s0 + $0x10] sm:$0xff]  ;;  %v1030_v21 = vld [vmem:[%s1411_s0 + $0x8] sm:$0xff]  ;;  %85 = vst.msk [vmem:[#allocation2] sm:$0x1] %vm84_vm3, %v942_v50 }
   0xf   :  { %v391_v19 = vsel %vm390_vm0, %v1018_v18, -inf  ;;  %v397_v22 = vsel %vm390_vm0, %v1025_v20, -inf  ;;  %v394_v23 = vsel %vm390_vm0, %v1030_v21, -inf  ;;  %v1039_v24 = vld [vmem:[%s1411_s0 + $0x18] sm:$0xff]  ;;  %v1044_v25 = vld [vmem:[%s1411_s0 + $0x20] sm:$0xff]  ;;  %v1053_v28 = vld [vmem:[%s1411_s0 + $0x28] sm:$0xff] }
  0x10   :  { %v400_v26 = vsel %vm390_vm0, %v1039_v24, -inf  ;;  %v403_v27 = vsel %vm390_vm0, %v1044_v25, -inf  ;;  %v1058_v29 = vld [vmem:[%s1411_s0 + $0x30] sm:$0xff]  ;;  %v406_v30 = vsel %vm390_vm0, %v1053_v28, -inf  ;;  %v1067_v32 = vld [vmem:[%s1411_s0 + $0x38] sm:$0xff]  ;;  %v1072_v33 = vld [vmem:[%s1411_s0 + $0x40] sm:$0xff] }
  0x11   :  { %v409_v31 = vsel %vm390_vm0, %v1058_v29, -inf  ;;  %v412_v34 = vsel %vm390_vm0, %v1067_v32, -inf  ;;  %v415_v35 = vsel %vm390_vm0, %v1072_v33, -inf  ;;  %v1081_v36 = vld [vmem:[%s1411_s0 + $0x48] sm:$0xff]  ;;  %v1086_v37 = vld [vmem:[%s1411_s0 + $0x50] sm:$0xff]  ;;  %v1095_v40 = vld [vmem:[%s1411_s0 + $0x58] sm:$0xff] }
  0x12   :  { %200 = vperm.xlu1 %850, %v111_v10   ;;  %197 = vperm.xlu0 %849, %v110_v11   ;;  %v418_v38 = vsel %vm390_vm0, %v1081_v36, -inf  ;;  %v421_v39 = vsel %vm390_vm0, %v1086_v37, -inf  ;;  %v1100_v41 = vld [vmem:[%s1411_s0 + $0x60] sm:$0xff]  ;;  %v424_v42 = vsel %vm390_vm0, %v1095_v40, -inf  ;;  %v1109_v44 = vld [vmem:[%s1411_s0 + $0x68] sm:$0xff]  ;;  %v1114_v45 = vld [vmem:[%s1411_s0 + $0x70] sm:$0xff] }
  0x13   :  { %v427_v43 = vsel %vm390_vm0, %v1100_v41, -inf  ;;  %v430_v46 = vsel %vm390_vm0, %v1109_v44, -inf  ;;  %v433_v47 = vsel %vm390_vm0, %v1114_v45, -inf  ;;  %v1123_v48 = vld [vmem:[%s1411_s0 + $0x78] sm:$0xff]  ;;  %v943_v61 = vmov 1.0|1.0  }
  0x14   :  { %v436_v49 = vsel %vm390_vm0, %v1123_v48, -inf }
  0x16   :  { %206 = vperm.xlu1 %850, %v113_v12   ;;  %203 = vperm.xlu0 %849, %v112_v13  }
  0x1a   :  { %212 = vperm.xlu1 %850, %v115_v14   ;;  %209 = vperm.xlu0 %849, %v114_v15  }
  0x1e   :  { %218 = vperm.xlu1 %850, %v117_v16   ;;  %215 = vperm.xlu0 %849, %v116_v17   ;;  %v944_v17 = vmov 1.0  }
  0x3d   :  { %392 = vmax.xlane.f32.xlu0 %v391_v19 }
  0x41   :  { %398 = vmax.xlane.f32.xlu0 %v397_v22 }
  0x42   :  { %395 = vmax.xlane.f32.xlu1 %v394_v23 }
  0x45   :  { %401 = vmax.xlane.f32.xlu0 %v400_v26 }
  0x46   :  { %404 = vmax.xlane.f32.xlu1 %v403_v27 }
  0x49   :  { %407 = vmax.xlane.f32.xlu0 %v406_v30 }
  0x4a   :  { %410 = vmax.xlane.f32.xlu1 %v409_v31 }
  0x4d   :  { %413 = vmax.xlane.f32.xlu0 %v412_v34 }
  0x4e   :  { %416 = vmax.xlane.f32.xlu1 %v415_v35 }
  0x51   :  { %419 = vmax.xlane.f32.xlu0 %v418_v38 }
  0x52   :  { %422 = vmax.xlane.f32.xlu1 %v421_v39 }
  0x55   :  { %425 = vmax.xlane.f32.xlu0 %v424_v42 }
  0x56   :  { %428 = vmax.xlane.f32.xlu1 %v427_v43 }
  0x59   :  { %431 = vmax.xlane.f32.xlu0 %v430_v46 }
  0x5a   :  { %434 = vmax.xlane.f32.xlu1 %v433_v47 }
  0x5d   :  { %437 = vmax.xlane.f32.xlu0 %v436_v49 }
  0x81   :  { %v180_v53 = vpop.permute.xlu1 %179  ;;  %v174_v54 = vpop.permute.xlu0 %173 }
  0x82   :  { %vm220_vm4 = vcmp.eq.s32.totalorder %v174_v54, %v1132_v52  ;;  %vm222_vm5 = vcmp.eq.s32.totalorder %v180_v53, %v1132_v52 }
  0x83   :  { %v567_v55 = vsel %vm220_vm4, %v1018_v18, 0.0  ;;  %v569_v0 = vsel %vm222_vm5, %v1025_v20, 0.0 }
  0x84   :  { %v583_v56 = vsel %vm390_vm0, %v567_v55, 0.0  ;;  %v589_v1 = vsel %vm390_vm0, %v569_v0, 0.0 }
  0x85   :  { %v183_v57 = vpop.permute.xlu1 %182  ;;  %v177_v58 = vpop.permute.xlu0 %176  ;;  %584 = vadd.xlane.f32.xlu0 %v583_v56 }
  0x86   :  { %vm221_vm6 = vcmp.eq.s32.totalorder %v177_v58, %v1132_v52  ;;  %vm223_vm8 = vcmp.eq.s32.totalorder %v183_v57, %v1132_v52 }
  0x87   :  { %v568_v59 = vsel %vm221_vm6, %v1030_v21, 0.0  ;;  %vm819_vm7 = vmpackc.low %vm221_vm6, %vm220_vm4  ;;  %v570_v4 = vsel %vm223_vm8, %v1039_v24, 0.0 }
  0x88   :  { %v586_v60 = vsel %vm390_vm0, %v568_v59, 0.0  ;;  %820 = vmatpush3.bf16.msk.msra.mxu0 %vm819_vm7, %v943_v61  ;;  %vm822_vm9 = vmpackc.low %vm223_vm8, %vm222_vm5  ;;  %v592_v5 = vsel %vm390_vm0, %v570_v4, 0.0 }
  0x89   :  { %v1142_v62 = vpop.permute.xlu1 %188  ;;  %v186_v63 = vpop.permute.xlu0 %185  ;;  %587 = vadd.xlane.f32.xlu1 %v586_v60  ;;  %821 = vmatprep.subr.bf16.mxu0 %v940_v9 }
  0x8a   :  { %vm225_vm10 = vcmp.eq.s32.totalorder %v1142_v62, %v1132_v52  ;;  %vm224_vm11 = vcmp.eq.s32.totalorder %v186_v63, %v1132_v52 }
  0x8b   :  { %vm825_vm12 = vmpackc.low %vm225_vm10, %vm224_vm11  ;;  %v571_v8 = vsel %vm224_vm11, %v1044_v25, 0.0 }
  0x8c   :  { %823 = vmatpush3.bf16.msk.msra.mxu0 %vm822_vm9, %v943_v61  ;;  %v595_v10 = vsel %vm390_vm0, %v571_v8, 0.0 }
  0x8d   :  { %v1152_v2 = vpop.permute.xlu1 %194  ;;  %v1154_v3 = vpop.permute.xlu0 %191  ;;  %590 = vadd.xlane.f32.xlu1 %v589_v1  ;;  %824 = vmatprep.subr.bf16.mxu0 %v940_v9 }
  0x8e   :  { %vm227_vm13 = vcmp.eq.s32.totalorder %v1152_v2, %v1132_v52  ;;  %vm226_vm14 = vcmp.eq.s32.totalorder %v1154_v3, %v1132_v52 }
  0x8f   :  { %vm828_vm15 = vmpackc.low %vm227_vm13, %vm226_vm14 }
  0x90   :  { %826 = vmatpush3.bf16.msk.msra.mxu0 %vm825_vm12, %v943_v61 }
  0x91   :  { %v1168_v6 = vpop.permute.xlu1 %200  ;;  %v1170_v7 = vpop.permute.xlu0 %197  ;;  %593 = vadd.xlane.f32.xlu1 %v592_v5  ;;  %827 = vmatprep.subr.bf16.mxu0 %v940_v9 }
  0x92   :  { %vm229_vm1 = vcmp.eq.s32.totalorder %v1168_v6, %v1132_v52  ;;  %vm228_vm4 = vcmp.eq.s32.totalorder %v1170_v7, %v1132_v52 }
  0x93   :  { %vm831_vm5 = vmpackc.low %vm229_vm1, %vm228_vm4 }
  0x94   :  { %829 = vmatpush3.bf16.msk.msra.mxu0 %vm828_vm15, %v943_v61 }
  0x95   :  { %v1185_v11 = vpop.permute.xlu1 %206  ;;  %v1187_v12 = vpop.permute.xlu0 %203  ;;  %596 = vadd.xlane.f32.xlu1 %v595_v10  ;;  %830 = vmatprep.subr.bf16.mxu0 %v940_v9 }
  0x96   :  { %vm231_vm6 = vcmp.eq.s32.totalorder %v1185_v11, %v1132_v52  ;;  %vm230_vm7 = vcmp.eq.s32.totalorder %v1187_v12, %v1132_v52 }
  0x97   :  { %vm834_vm8 = vmpackc.low %vm231_vm6, %vm230_vm7 }
  0x98   :  { %832 = vmatpush3.bf16.msk.msra.mxu0 %vm831_vm5, %v943_v61 }
  0x99   :  { %v1200_v13 = vpop.permute.xlu1 %212  ;;  %v1202_v14 = vpop.permute.xlu0 %209  ;;  %833 = vmatprep.subr.bf16.mxu0 %v940_v9 }
  0x9a   :  { %vm233_vm9 = vcmp.eq.s32.totalorder %v1200_v13, %v1132_v52  ;;  %vm232_vm11 = vcmp.eq.s32.totalorder %v1202_v14, %v1132_v52 }
  0x9b   :  { %vm837_vm12 = vmpackc.low %vm233_vm9, %vm232_vm11 }
  0x9c   :  { %835 = vmatpush3.bf16.msk.msra.mxu0 %vm834_vm8, %v943_v61 }
  0x9d   :  { %v1215_v15 = vpop.permute.xlu1 %218  ;;  %v1217_v16 = vpop.permute.xlu0 %215  ;;  %836 = vmatprep.subr.bf16.mxu0 %v940_v9 }
  0x9e   :  { %vm235_vm15 = vcmp.eq.s32.totalorder %v1215_v15, %v1132_v52  ;;  %vm234_vm5 = vcmp.eq.s32.totalorder %v1217_v16, %v1132_v52  ;;  %v578_v16 = vsel %vm231_vm6, %v1095_v40, 0.0 }
  0x9f   :  { %vm840_vm8 = vmpackc.low %vm235_vm15, %vm234_vm5 }
  0xa0   :  { %838 = vmatpush3.bf16.msk.msra.mxu0 %vm837_vm12, %v943_v61 }
  0xa1   :  { %839 = vmatprep.subr.bf16.mxu0 %v940_v9 }
  0xa4   :  { %841 = vmatpush3.bf16.msk.msra.mxu0 %vm840_vm8, %v943_v61 }
  0xa7   :  { %816 = vmatmul.mubr.f32.vlgmr.msra.gmra.mrb[0].mxu0 %v944_v17 }
  0xca   :  { %v1237_v19 = vpop.xlane.xlu0 %392 }
  0xcb   :  { %v439_v22 = vsub.f32 %v1018_v18, %v1237_v19 }
  0xcd   :  { %v455_v23 = vmul.f32 1.442695, %v439_v22 }
  0xce   :  { %v1241_v26 = vpop.xlane.xlu0 %398 }
  0xcf   :  { %851 = vpow2.f32 %v455_v23  ;;  %v441_v9 = vsub.f32 %v1025_v20, %v1241_v26  ;;  %v1245_v27 = vpop.xlane.xlu1 %395 }
  0xd0   :  { %v440_v30 = vsub.f32 %v1030_v21, %v1245_v27 }
  0xd1   :  { %v459_v31 = vmul.f32 1.442695, %v441_v9 }
  0xd2   :  { %v457_v34 = vmul.f32 1.442695, %v440_v30  ;;  %v1249_v35 = vpop.xlane.xlu0 %401 }
  0xd3   :  { %853 = vpow2.f32 %v459_v31  ;;  %v1251_v38 = vpop.xlane.xlu1 %404  ;;  %v442_v18 = vsub.f32 %v1039_v24, %v1249_v35 }
  0xd4   :  { %855 = vpow2.f32 %v457_v34  ;;  %v443_v39 = vsub.f32 %v1044_v25, %v1251_v38 }
  0xd5   :  { %v461_v20 = vmul.f32 1.442695, %v442_v18 }
  0xd6   :  { %v463_v42 = vmul.f32 1.442695, %v443_v39  ;;  %v1257_v43 = vpop.xlane.xlu0 %407 }
  0xd7   :  { %857 = vpow2.f32 %v461_v20  ;;  %v1259_v21 = vpop.xlane.xlu1 %410  ;;  %v444_v46 = vsub.f32 %v1053_v28, %v1257_v43 }
  0xd8   :  { %859 = vpow2.f32 %v463_v42  ;;  %v445_v47 = vsub.f32 %v1058_v29, %v1259_v21 }
  0xd9   :  { %v852_v49 = vpop.eup %851  ;;  %v465_v24 = vmul.f32 1.442695, %v444_v46 }
  0xda   :  { %v467_v50 = vmul.f32 1.442695, %v445_v47  ;;  %v487_v51 = vsel %vm390_vm0, %v852_v49, 0.0  ;;  %v1266_v25 = vpop.xlane.xlu0 %413 }
  0xdb   :  { %861 = vpow2.f32 %v465_v24  ;;  %v1268_v53 = vpop.xlane.xlu1 %416  ;;  %488 = vadd.xlane.f32.xlu1 %v487_v51  ;;  %v446_v54 = vsub.f32 %v1067_v32, %v1266_v25 }
  0xdc   :  { %863 = vpow2.f32 %v467_v50  ;;  %v447_v55 = vsub.f32 %v1072_v33, %v1268_v53 }
  0xdd   :  { %v854_v56 = vpop.eup %853  ;;  %v469_v57 = vmul.f32 1.442695, %v446_v54 }
  0xde   :  { %v856_v58 = vpop.eup %855  ;;  %v471_v59 = vmul.f32 1.442695, %v447_v55  ;;  %v493_v60 = vsel %vm390_vm0, %v854_v56, 0.0  ;;  %v1275_v61 = vpop.xlane.xlu0 %419 }
  0xdf   :  { %865 = vpow2.f32 %v469_v57  ;;  %494 = vadd.xlane.f32.xlu1 %v493_v60  ;;  %v448_v63 = vsub.f32 %v1081_v36, %v1275_v61  ;;  %v490_v0 = vsel %vm390_vm0, %v856_v58, 0.0  ;;  %v1280_v1 = vpop.xlane.xlu1 %422  ;;  %v572_v58 = vsel %vm225_vm10, %v1053_v28, 0.0 }
  0xe0   :  { %867 = vpow2.f32 %v471_v59  ;;  %491 = vadd.xlane.f32.xlu0 %v490_v0  ;;  %v449_v4 = vsub.f32 %v1086_v37, %v1280_v1  ;;  %v573_v28 = vsel %vm226_vm14, %v1058_v29, 0.0 }
  0xe1   :  { %v858_v5 = vpop.eup %857  ;;  %v473_v8 = vmul.f32 1.442695, %v448_v63 }
  0xe2   :  { %v860_v10 = vpop.eup %859  ;;  %v475_v17 = vmul.f32 1.442695, %v449_v4  ;;  %v496_v22 = vsel %vm390_vm0, %v858_v5, 0.0  ;;  %v1285_v23 = vpop.xlane.xlu0 %425  ;;  %v598_v5 = vsel %vm390_vm0, %v572_v58, 0.0 }
  0xe3   :  { %869 = vpow2.f32 %v473_v8  ;;  %v499_v9 = vsel %vm390_vm0, %v860_v10, 0.0  ;;  %v450_v30 = vsub.f32 %v1095_v40, %v1285_v23  ;;  %v1290_v31 = vpop.xlane.xlu1 %428 }
  0xe4   :  { %871 = vpow2.f32 %v475_v17  ;;  %500 = vadd.xlane.f32.xlu1 %v499_v9  ;;  %497 = vadd.xlane.f32.xlu0 %v496_v22  ;;  %v451_v34 = vsub.f32 %v1100_v41, %v1290_v31  ;;  %v601_v22 = vsel %vm390_vm0, %v573_v28, 0.0 }
  0xe5   :  { %v862_v18 = vpop.eup %861  ;;  %v477_v39 = vmul.f32 1.442695, %v450_v30  ;;  %v574_v30 = vsel %vm227_vm13, %v1067_v32, 0.0  ;;  %v577_v32 = vsel %vm230_vm7, %v1086_v37, 0.0  ;;  %v581_v37 = vsel %vm234_vm5, %v1114_v45, 0.0 }
  0xe6   :  { %v864_v20 = vpop.eup %863  ;;  %v502_v42 = vsel %vm390_vm0, %v862_v18, 0.0  ;;  %v1295_v46 = vpop.xlane.xlu0 %431  ;;  %v479_v49 = vmul.f32 1.442695, %v451_v34  ;;  %v604_v34 = vsel %vm390_vm0, %v574_v30, 0.0  ;;  %v575_v18 = vsel %vm228_vm4, %v1072_v33, 0.0 }
  0xe7   :  { %v505_v47 = vsel %vm390_vm0, %v864_v20, 0.0  ;;  %873 = vpow2.f32 %v477_v39  ;;  %v452_v24 = vsub.f32 %v1109_v44, %v1295_v46  ;;  %v1300_v51 = vpop.xlane.xlu1 %434  ;;  %v579_v33 = vsel %vm232_vm11, %v1100_v41, 0.0  ;;  %v316_v30 = vld [vmem:[%s1413_s2] sm:$0x1] }
  0xe8   :  { %506 = vadd.xlane.f32.xlu1 %v505_v47  ;;  %503 = vadd.xlane.f32.xlu0 %v502_v42  ;;  %875 = vpow2.f32 %v479_v49  ;;  %v453_v59 = vsub.f32 %v1114_v45, %v1300_v51  ;;  %v607_v42 = vsel %vm390_vm0, %v575_v18, 0.0  ;;  %v613_v49 = vsel %vm390_vm0, %v577_v32, 0.0 }
  0xe9   :  { %v866_v50 = vpop.eup %865  ;;  %v481_v57 = vmul.f32 1.442695, %v452_v24  ;;  %v576_v41 = vsel %vm229_vm1, %v1081_v36, 0.0  ;;  %v616_v45 = vsel %vm390_vm0, %v578_v16, 0.0  ;;  %v582_v36 = vsel %vm235_vm15, %v1123_v48, 0.0 }
  0xea   :  { %v868_v54 = vpop.eup %867  ;;  %v508_v55 = vsel %vm390_vm0, %v866_v50, 0.0  ;;  %v1310_v63 = vpop.xlane.xlu0 %437  ;;  %v483_v8 = vmul.f32 1.442695, %v453_v59  ;;  %v619_v50 = vsel %vm390_vm0, %v579_v33, 0.0  ;;  %v610_v14 = vsel %vm390_vm0, %v576_v41, 0.0 }
  0xeb   :  { %v511_v56 = vsel %vm390_vm0, %v868_v54, 0.0  ;;  %877 = vpow2.f32 %v481_v57  ;;  %v454_v62 = vsub.f32 %v1123_v48, %v1310_v63  ;;  %v625_v54 = vsel %vm390_vm0, %v581_v37, 0.0 }
  0xec   :  { %512 = vadd.xlane.f32.xlu1 %v511_v56  ;;  %509 = vadd.xlane.f32.xlu0 %v508_v55  ;;  %879 = vpow2.f32 %v483_v8  ;;  %v580_v55 = vsel %vm233_vm9, %v1109_v44, 0.0  ;;  %v628_v6 = vsel %vm390_vm0, %v582_v36, 0.0 }
  0xed   :  { %v870_v60 = vpop.eup %869  ;;  %v485_v9 = vmul.f32 1.442695, %v454_v62  ;;  %v622_v56 = vsel %vm390_vm0, %v580_v55, 0.0 }
  0xee   :  { %v872_v0 = vpop.eup %871  ;;  %v514_v4 = vsel %vm390_vm0, %v870_v60, 0.0 }
  0xef   :  { %v517_v10 = vsel %vm390_vm0, %v872_v0, 0.0  ;;  %881 = vpow2.f32 %v485_v9 }
  0xf0   :  { %599 = vadd.xlane.f32.xlu1 %v598_v5  ;;  %515 = vadd.xlane.f32.xlu0 %v514_v4 }
  0xf1   :  { %v874_v17 = vpop.eup %873 }
  0xf2   :  { %v520_v3 = vsel %vm390_vm0, %v874_v17, 0.0  ;;  %v876_v29 = vpop.eup %875 }
  0xf3   :  { %v523_v39 = vsel %vm390_vm0, %v876_v29, 0.0 }
  0xf4   :  { %602 = vadd.xlane.f32.xlu1 %v601_v22  ;;  %518 = vadd.xlane.f32.xlu0 %v517_v10 }
  0xf5   :  { %v878_v20 = vpop.eup %877 }
  0xf6   :  { %v526_v2 = vsel %vm390_vm0, %v878_v20, 0.0  ;;  %v880_v47 = vpop.eup %879 }
  0xf7   :  { %v529_v7 = vsel %vm390_vm0, %v880_v47, 0.0 }
  0xf8   :  { %605 = vadd.xlane.f32.xlu1 %v604_v34  ;;  %521 = vadd.xlane.f32.xlu0 %v520_v3 }
  0xf9   :  { %v882_v24 = vpop.eup %881 }
  0xfa   :  { %v532_v12 = vsel %vm390_vm0, %v882_v24, 0.0 }
  0xfc   :  { %608 = vadd.xlane.f32.xlu1 %v607_v42  ;;  %524 = vadd.xlane.f32.xlu0 %v523_v39 }
 0x100   :  { %614 = vadd.xlane.f32.xlu1 %v613_v49  ;;  %527 = vadd.xlane.f32.xlu0 %v526_v2 }
 0x104   :  { %620 = vadd.xlane.f32.xlu1 %v619_v50  ;;  %530 = vadd.xlane.f32.xlu0 %v529_v7 }
 0x108   :  { %626 = vadd.xlane.f32.xlu1 %v625_v54  ;;  %533 = vadd.xlane.f32.xlu0 %v532_v12 }
 0x10c   :  { %611 = vadd.xlane.f32.xlu0 %v610_v14 }
 0x110   :  { %617 = vadd.xlane.f32.xlu0 %v616_v45 }
 0x112   :  { %v585_v60 = vpop.xlane.xlu0 %584 }
 0x114   :  { %623 = vadd.xlane.f32.xlu0 %v622_v56 }
 0x116   :  { %v588_v40 = vpop.xlane.xlu1 %587 }
 0x118   :  { %629 = vadd.xlane.f32.xlu0 %v628_v6 }
 0x11a   :  { %v591_v11 = vpop.xlane.xlu1 %590 }
 0x11e   :  { %v594_v57 = vpop.xlane.xlu1 %593 }
 0x122   :  { %v1372_v58 = vpop.xlane.xlu1 %596 }
 0x168   :  { %v489_v59 = vpop.xlane.xlu1 %488 }
 0x169   :  { %883 = vlog2.f32 %v489_v59 }
 0x16c   :  { %v495_v44 = vpop.xlane.xlu1 %494 }
 0x16d   :  { %885 = vlog2.f32 %v495_v44  ;;  %v492_v13 = vpop.xlane.xlu0 %491 }
 0x16e   :  { %887 = vlog2.f32 %v492_v13 }
 0x171   :  { %v501_v0 = vpop.xlane.xlu1 %500  ;;  %v498_v4 = vpop.xlane.xlu0 %497 }
 0x172   :  { %889 = vlog2.f32 %v501_v0 }
 0x173   :  { %v884_v52 = vpop.eup %883  ;;  %891 = vlog2.f32 %v498_v4 }
 0x174   :  { %v536_v48 = vmul.f32 0.6931472, %v884_v52 }
 0x175   :  { %v507_v15 = vpop.xlane.xlu1 %506  ;;  %v504_v5 = vpop.xlane.xlu0 %503 }
 0x176   :  { %893 = vlog2.f32 %v504_v5  ;;  %v631_v10 = vadd.f32 %v536_v48, %v1237_v19 }
 0x177   :  { %v886_v8 = vpop.eup %885  ;;  %895 = vlog2.f32 %v507_v15 }
 0x178   :  { %v888_v28 = vpop.eup %887  ;;  %v540_v62 = vmul.f32 0.6931472, %v886_v8  ;;  %v647_v32 = vsub.f32 %v631_v10, %v585_v60 }
 0x179   :  { %v538_v17 = vmul.f32 0.6931472, %v888_v28  ;;  %v513_v22 = vpop.xlane.xlu1 %512  ;;  %v510_v9 = vpop.xlane.xlu0 %509 }
 0x17a   :  { %v383_v29 = vpop.f32.mrb[0].mxu0  ;;  %v633_v18 = vadd.f32 %v540_v62, %v1241_v26  ;;  %897 = vlog2.f32 %v510_v9 }
 0x17b   :  { %v632_v3 = vadd.f32 %v538_v17, %v1245_v27  ;;  %v387_v39 = vadd.f32 %v383_v29, %v316_v30  ;;  %v817_v20 = vpop.f32.mrb[1].mxu0  ;;  %899 = vlog2.f32 %v513_v22 }
 0x17c   :  { %v890_v34 = vpop.eup %889  ;;  %v649_v33 = vsub.f32 %v633_v18, %v591_v11 }
 0x17d   :  { %v892_v42 = vpop.eup %891  ;;  %v648_v2 = vsub.f32 %v632_v3, %v588_v40  ;;  %v516_v19 = vpop.xlane.xlu0 %515  ;;  %389 = vst.msk [vmem:[%s1413_s2] sm:$0x1] %vm82_vm2, %v387_v39  ;;  %v544_v7 = vmul.f32 0.6931472, %v890_v34  ;;  %s945_s2 = smov [#allocation2]  }
 0x17e   :  { %v542_v47 = vmul.f32 0.6931472, %v892_v42  ;;  %v600_v27 = vpop.xlane.xlu1 %599  ;;  %s712_s25 = sshll.u32 %s945_s2, 4  ;;  %s713_s25 = int_to_ptr.vmem [resolvable:$true] %s712_s25 }
 0x17f   :  { %v680_v49 = vadd.f32 %v648_v2, %v647_v32  ;;  %v635_v41 = vadd.f32 %v544_v7, %v1251_v38  ;;  %s915_s26 = scalar_lea.vmem %s713_s25, 16  ;;  %s919_s27 = scalar_lea.vmem %s713_s25, 32 }
 0x180   :  { %v634_v24 = vadd.f32 %v542_v47, %v1249_v35  ;;  %v894_v26 = vpop.eup %893  ;;  %p916_p0 = scmp.ne.s32.totalorder %s713_s25, %s915_s26  ;;  %p920_p1 = scmp.lt.s32.totalorder %s713_s25, %s713_s25 }
 0x181   :  { %v519_v50 = vpop.xlane.xlu0 %518  ;;  %v546_v12 = vmul.f32 0.6931472, %v894_v26  ;;  %v681_v54 = vadd.f32 %v680_v49, %v649_v33  ;;  %v896_v14 = vpop.eup %895  ;;  %v651_v35 = vsub.f32 %v635_v41, %v1372_v58  ;;  %p921_p2 = scmp.lt.s32.totalorder %s919_s27, %s915_s26 }
 0x182   :  { %v650_v37 = vsub.f32 %v634_v24, %v594_v57  ;;  %v603_v16 = vpop.xlane.xlu1 %602  ;;  %901 = vlog2.f32 %v519_v50  ;;  %v548_v6 = vmul.f32 0.6931472, %v896_v14 }
 0x183   :  { %v636_v55 = vadd.f32 %v546_v12, %v1257_v43  ;;  %903 = vlog2.f32 %v516_v19  ;;  %p922_p3 = por %p921_p2, %p920_p1 }
 0x184   :  { %v682_v56 = vadd.f32 %v681_v54, %v650_v37  ;;  %v898_v36 = vpop.eup %897  ;;  %v637_v38 = vadd.f32 %v548_v6, %v1259_v21 }
 0x185   :  { %v522_v45 = vpop.xlane.xlu0 %521  ;;  %v550_v11 = vmul.f32 0.6931472, %v898_v36  ;;  %v652_v59 = vsub.f32 %v636_v55, %v600_v27  ;;  %v900_v60 = vpop.eup %899  ;;  %p923_p4 = pnand %p922_p3, %p916_p0 }
 0x186   :  { %v683_v57 = vadd.f32 %v682_v56, %v651_v35  ;;  %905 = vlog2.f32 %v522_v45  ;;  %v606_v44 = vpop.xlane.xlu1 %605  ;;  %v552_v0 = vmul.f32 0.6931472, %v900_v60  ;;  %v653_v48 = vsub.f32 %v637_v38, %v603_v16  ;;  %v679_v38 = vld [vmem:[#allocation2] sm:$0x1] }
 0x187   :  { %v638_v4 = vadd.f32 %v550_v11, %v1266_v25 }
 0x188   :  { %v684_v43 = vadd.f32 %v683_v57, %v652_v59  ;;  %v639_v62 = vadd.f32 %v552_v0, %v1268_v53 }
 0x189   :  { %v525_v40 = vpop.xlane.xlu0 %524  ;;  %v654_v28 = vsub.f32 %v638_v4, %v606_v44 }
 0x18a   :  { %907 = vlog2.f32 %v525_v40  ;;  %v609_v58 = vpop.xlane.xlu1 %608  ;;  %v685_v8 = vadd.f32 %v684_v43, %v653_v48 }
 0x18b   :  { %v655_v3 = vsub.f32 %v639_v62, %v609_v58 }
 0x18c   :  { %v902_v52 = vpop.eup %901  ;;  %v686_v30 = vadd.f32 %v685_v8, %v654_v28 }
 0x18d   :  { %v528_v13 = vpop.xlane.xlu0 %527  ;;  %v904_v15 = vpop.eup %903  ;;  %v556_v10 = vmul.f32 0.6931472, %v902_v52 }
 0x18e   :  { %909 = vlog2.f32 %v528_v13  ;;  %v554_v22 = vmul.f32 0.6931472, %v904_v15  ;;  %v615_v25 = vpop.xlane.xlu1 %614  ;;  %v687_v32 = vadd.f32 %v686_v30, %v655_v3 }
 0x18f   :  { %v641_v29 = vadd.f32 %v556_v10, %v1280_v1 }
 0x190   :  { %v906_v17 = vpop.eup %905  ;;  %v640_v39 = vadd.f32 %v554_v22, %v1275_v61 }
 0x191   :  { %v531_v5 = vpop.xlane.xlu0 %530  ;;  %v558_v34 = vmul.f32 0.6931472, %v906_v17  ;;  %v657_v2 = vsub.f32 %v641_v29, %v615_v25 }
 0x192   :  { %911 = vlog2.f32 %v531_v5  ;;  %v621_v7 = vpop.xlane.xlu1 %620 }
 0x193   :  { %v642_v33 = vadd.f32 %v558_v34, %v1285_v23 }
 0x194   :  { %v908_v21 = vpop.eup %907 }
 0x195   :  { %v534_v9 = vpop.xlane.xlu0 %533  ;;  %v560_v18 = vmul.f32 0.6931472, %v908_v21 }
 0x196   :  { %913 = vlog2.f32 %v534_v9 }
 0x197   :  { %v643_v49 = vadd.f32 %v560_v18, %v1290_v31  ;;  %v627_v31 = vpop.xlane.xlu1 %626 }
 0x198   :  { %v910_v20 = vpop.eup %909 }
 0x199   :  { %v612_v42 = vpop.xlane.xlu0 %611  ;;  %v562_v47 = vmul.f32 0.6931472, %v910_v20  ;;  %v659_v12 = vsub.f32 %v643_v49, %v621_v7 }
 0x19a   :  { %v656_v53 = vsub.f32 %v640_v39, %v612_v42 }
 0x19b   :  { %v644_v41 = vadd.f32 %v562_v47, %v1295_v46 }
 0x19c   :  { %v912_v19 = vpop.eup %911  ;;  %v688_v27 = vadd.f32 %v687_v32, %v656_v53 }
 0x19d   :  { %v564_v24 = vmul.f32 0.6931472, %v912_v19  ;;  %v618_v26 = vpop.xlane.xlu0 %617 }
 0x19e   :  { %v689_v1 = vadd.f32 %v688_v27, %v657_v2  ;;  %v658_v50 = vsub.f32 %v642_v33, %v618_v26 }
 0x19f   :  { %v645_v61 = vadd.f32 %v564_v24, %v1300_v51 }
 0x1a0   :  { %v914_v37 = vpop.eup %913  ;;  %v690_v54 = vadd.f32 %v689_v1, %v658_v50 }
 0x1a1   :  { %v566_v14 = vmul.f32 0.6931472, %v914_v37  ;;  %v624_v16 = vpop.xlane.xlu0 %623  ;;  %v661_v23 = vsub.f32 %v645_v61, %v627_v31 }
 0x1a2   :  { %v691_v45 = vadd.f32 %v690_v54, %v659_v12  ;;  %v660_v55 = vsub.f32 %v644_v41, %v624_v16 }
 0x1a3   :  { %v646_v56 = vadd.f32 %v566_v14, %v1310_v63 }
 0x1a4   :  { %v692_v36 = vadd.f32 %v691_v45, %v660_v55 }
 0x1a5   :  { %v630_v6 = vpop.xlane.xlu0 %629 }
 0x1a6   :  { %v693_v35 = vadd.f32 %v692_v36, %v661_v23  ;;  %v662_v40 = vsub.f32 %v646_v56, %v630_v6 }
 0x1a8   :  { %v694_v11 = vadd.f32 %v693_v35, %v662_v40 }
 0x1aa   :  { %v695_v59 = vrot.slane %v694_v11, 4 }
 0x1ac   :  { %v696_v57 = vadd.f32 %v695_v59, %v694_v11 }
 0x1ae   :  { %v697_v60 = vrot.slane %v696_v57, 2 }
 0x1b0   :  { %v698_v51 = vadd.f32 %v697_v60, %v696_v57 }
 0x1b2   :  { %v699_v44 = vrot.slane %v698_v51, 1 }
 0x1b4   :  { %v700_v46 = vadd.f32 %v699_v44, %v698_v51 }
 0x1b6   :  { %v701_v13 = vadd.f32 %v700_v46, %v679_v38 }
 0x1b8   :  { %703 = vst.msk [vmem:[#allocation2] sm:$0x1] %vm84_vm3, %v701_v13 }
 0x1b9   :  { %926 = shalt.err (!%p923_p4)
}
 0x1ba   :  { %s927_s30 = scalar_lea.hbm %s1414_s3, 16 }
 0x1bb   :  { %p928_p5 = scmp.ne.s32.totalorder %s1414_s3, %s927_s30  ;;  %p931_p6 = scmp.lt.u32.totalorder %s927_s30, %s1414_s3 }
 0x1bd   :  { %p933_p7 = pnand %p931_p6, %p928_p5 }
 0x1bf   :  { %936 = shalt.err (!%p933_p7)
}
 0x1c0   :  { %715 = dma.vmem_to_hbm [thread:$0]  %s713_s25, 16, %s1414_s3, [#allocation3]  }
 0x1c1   :  { %937 = dma.done.wait [#allocation3], 16  }
 0x1c2   :  { %938 = vsyncadd [#allocation3], 4294967280 }
 0x1c3   :  { %721 = vsyncpa [#allocation3], 1 }

</bundles_post_ra>
